<compile_context>
chip_gen: v6e
topology: v6e:2x2x1
jax: 0.10.0
libtpu: 0.0.40
codegen_flags: <defaults>
</compile_context>

<pallas_src>
import functools

import jax
import jax.numpy as jnp
from jax.experimental import pallas as pl
from jax.experimental.pallas import tpu as pltpu


def _causal_conv1d_kernel(xc_ref, xh_ref, w_ref, b_ref, o_ref, xwin_ref, *,
                          k_taps, dilation, halo, hb, tile_len, seq_len,
                          interior_tiles):
    """One (batch row, output length tile) grid step.

    xc_ref  : (C_in, TL)        current x tile (clamped at the last x block)
    xh_ref  : (C_in, HB)        128-aligned block ending at col j*TL (clamped)
    w_ref   : (K, C_out, C_in)  full weight, tap-major
    b_ref   : (C_out, 1)        bias (f32)
    o_ref   : (C_out, TL)       output tile
    xwin_ref: (C_in, halo+TL)   staging window = [left halo | current tile]
    """
    j = pl.program_id(1)
    cdt = xwin_ref.dtype

    if halo > 0:
        # Halo columns are global x columns [j*TL - halo, j*TL).  Masking with
        # their global index implements BOTH the left zero pad (j == 0, indices
        # negative) and the right zero pad / clamped-garbage neutralization
        # (indices >= seq_len).  Only `halo` (<= 128) columns: negligible VPU.
        start = j * tile_len - halo
        hcols = xh_ref[:, hb - halo:]
        icol = jax.lax.broadcasted_iota(jnp.int32, hcols.shape, 1) + start
        xwin_ref[:, :halo] = jnp.where(
            (icol >= 0) & (icol < seq_len), hcols, jnp.zeros_like(hcols)
        ).astype(cdt)

    # Current x tile.  Interior tiles (fully inside x) skip the mask entirely;
    # boundary / trailing tiles zero everything past the true sequence length
    # (this also neutralizes the clamped re-read on the trailing output tile).
    cur = xc_ref[...]
    is_interior = j < interior_tiles

    @pl.when(is_interior)
    def _():
        xwin_ref[:, halo:] = cur.astype(cdt)

    @pl.when(jnp.logical_not(is_interior))
    def _():
        col = jax.lax.broadcasted_iota(jnp.int32, cur.shape, 1)
        xwin_ref[:, halo:] = jnp.where(
            col < seq_len - j * tile_len, cur, jnp.zeros_like(cur)).astype(cdt)

    # out[:, t] = bias + sum_k W[k] @ window[:, t + k*dilation]
    # (window starts at global column j*TL - halo).  Accumulate in f32; init
    # from the broadcast bias instead of zeros + add.
    acc = jnp.broadcast_to(b_ref[...], o_ref.shape).astype(jnp.float32)
    for kk in range(k_taps):
        tap = xwin_ref[:, kk * dilation: kk * dilation + tile_len]
        acc = acc + jnp.dot(w_ref[kk], tap, preferred_element_type=jnp.float32)
    o_ref[...] = acc.astype(o_ref.dtype)


def _tpu_vmem_capacity_bytes():
    """Best-effort physical VMEM query; safe fallback if unavailable."""
    try:
        info = pltpu.get_tpu_info()
        cap = getattr(info, "vmem_capacity_bytes", None)
        if cap:
            return int(cap)
    except Exception:
        pass
    return 128 * 1024 * 1024  # v5e / v6e default


def _pick_tile_len(c_in, c_out, out_len, hb, itemsize):
    """Lane-tile sizing: multiple of 128 (and of the halo block), generation
    aware, and bounded so the live f32 accumulator doesn't turn spill-bound."""
    cap = _tpu_vmem_capacity_bytes()
    # v5e/v6e (128 MiB physical): ~20 MiB working-set budget.
    # v7x (64 MiB physical, 32 MiB scoped default): stay around ~10 MiB.
    budget = 20 * 1024 * 1024 if cap >= 96 * 1024 * 1024 else 10 * 1024 * 1024
    # Per output column: double-buffered x/out tiles, staging window, f32 acc.
    per_col = itemsize * (3 * c_in + 2 * c_out) + 4 * c_out
    tl = budget // max(per_col, 1)
    tl = min(2048, (tl // 128) * 128)
    # Keep the live (C_out, TL) f32 accumulator roughly within vreg reach.
    acc_cap = ((128 * 1024) // max(4 * c_out, 1)) // 128 * 128
    if acc_cap >= 128:
        tl = min(tl, acc_cap)
    # No wider than the (128-rounded) output length.
    tl = min(tl, ((out_len + 127) // 128) * 128)
    # Must be >= and a multiple of the halo block so its index is block-aligned.
    tl = max(tl, hb)
    tl = ((tl + hb - 1) // hb) * hb
    return int(tl)


def causal_conv1d(x, weight, bias, *, dilation, tile_len=None):
    """x: (N, C_in, L); weight: (C_out, C_in, K); bias: (C_out,).

    Matches nn.Conv1d(C_in, C_out, K, padding=(K-1)*dilation, dilation=dilation)
    with stride=1, groups=1: output length is L + (K-1)*dilation (no trim).
    """
    n, c_in, seq_len = x.shape
    c_out, c_in_w, k = weight.shape
    assert c_in_w == c_in, "groups != 1 is not supported"
    halo = (k - 1) * dilation          # == Conv1d `padding` on each side
    out_len = seq_len + halo           # = L + 2*pad - dilation*(K-1), stride=1

    # The halo is delivered as one 128-aligned block of x that ends at j*TL.
    hb = max(128, ((halo + 127) // 128) * 128)

    if tile_len is None:
        tile_len = _pick_tile_len(c_in, c_out, out_len, hb, x.dtype.itemsize)
    tile_len = max(int(tile_len), hb)
    tile_len = ((tile_len + hb - 1) // hb) * hb

    n_out_tiles = pl.cdiv(out_len, tile_len)
    last_x_tile = pl.cdiv(seq_len, tile_len) - 1     # clamp for trailing tiles
    last_hb_blk = pl.cdiv(seq_len, hb) - 1           # clamp for halo blocks
    blocks_per_tile = tile_len // hb
    interior_tiles = seq_len // tile_len             # tiles needing no mask

    # Tap-major weight so w_ref[k] is a contiguous (C_out, C_in) MXU operand.
    w_t = jnp.transpose(weight, (2, 0, 1))
    b2d = bias.reshape(c_out, 1).astype(jnp.float32)

    kern = functools.partial(
        _causal_conv1d_kernel, k_taps=k, dilation=dilation, halo=halo, hb=hb,
        tile_len=tile_len, seq_len=seq_len, interior_tiles=interior_tiles)

    cap = _tpu_vmem_capacity_bytes()
    vmem_limit = 64 * 1024 * 1024 if cap >= 96 * 1024 * 1024 else 32 * 1024 * 1024

    return pl.pallas_call(
        kern,
        out_shape=jax.ShapeDtypeStruct((n, c_out, out_len), x.dtype),
        grid_spec=pltpu.PrefetchScalarGridSpec(
            num_scalar_prefetch=0,
            grid=(n, n_out_tiles),
            in_specs=[
                # Un-padded x tiled along length; trailing output tiles (past
                # the end of x) re-use the last valid block, fully masked.
                pl.BlockSpec((None, c_in, tile_len),
                             lambda b, j: (b, 0, jnp.minimum(j, last_x_tile))),
                # 128-aligned block ending at column j*TL: its last `halo`
                # columns are this tile's left halo (clamped / masked at j==0).
                pl.BlockSpec((None, c_in, hb),
                             lambda b, j: (b, 0, jnp.clip(j * blocks_per_tile - 1,
                                                          0, last_hb_blk))),
                pl.BlockSpec((k, c_out, c_in), lambda b, j: (0, 0, 0)),
                pl.BlockSpec((c_out, 1), lambda b, j: (0, 0)),
            ],
            out_specs=pl.BlockSpec((None, c_out, tile_len), lambda b, j: (b, 0, j)),
            # Staging window in the INPUT dtype (bf16-ready), not f32.
            scratch_shapes=[pltpu.VMEM((c_in, halo + tile_len), x.dtype)],
        ),
        compiler_params=pltpu.CompilerParams(
            # No carried state between length tiles anymore: both grid axes are
            # independent, so megacore / v7x dual-TC can split on either.
            dimension_semantics=("parallel", "parallel"),
            vmem_limit_bytes=vmem_limit),
    )(x, x, w_t, b2d)


if __name__ == "__main__":
    def check(key, n, c_in, c_out, length, ksize, dil, tile_len=None):
        kx, kw, kb = jax.random.split(key, 3)
        fan_in = c_in * ksize
        bound = 1.0 / (fan_in ** 0.5)
        w = jax.random.uniform(kw, (c_out, c_in, ksize), jnp.float32, -bound, bound)
        b = jax.random.uniform(kb, (c_out,), jnp.float32, -bound, bound)
        x = jax.random.normal(kx, (n, c_in, length), jnp.float32)

        out = jax.block_until_ready(
            causal_conv1d(x, w, b, dilation=dil, tile_len=tile_len))

        pad = (ksize - 1) * dil
        ref = jax.lax.conv_general_dilated(
            x, w, window_strides=(1,), padding=[(pad, pad)],
            rhs_dilation=(dil,), dimension_numbers=("NCH", "OIH", "NCH"),
        ) + b[None, :, None]
        assert out.shape == ref.shape, (out.shape, ref.shape)
        assert float(jnp.max(jnp.abs(out - ref))) < 1e-4

    key = jax.random.PRNGKey(0)
    k1, k2 = jax.random.split(key)
    # Shapes implied by the module: batch=2, C_in=4, C_out=8, L=16, K=3, dil=2.
    check(k1, 2, 4, 8, 16, 3, 2)
    # Multi-tile case: exercises the halo-block delivery between length tiles,
    # the clamped trailing tile and the masked partial final output block.
    check(k2, 2, 4, 8, 255, 3, 3, tile_len=128)

    print("KERNEL_OK")
</pallas_src>

<mosaic_0001>
module attributes {stable_mosaic.version = 11 : i64} {
  func.func @_causal_conv1d_kernel(%arg0: i32, %arg1: i32, %arg2: memref<1x4x128xf32, #tpu.memory_space<vmem>>, %arg3: memref<1x4x128xf32, #tpu.memory_space<vmem>>, %arg4: memref<3x8x4xf32, #tpu.memory_space<vmem>>, %arg5: memref<8x1xf32, #tpu.memory_space<vmem>>, %arg6: memref<1x8x128xf32, #tpu.memory_space<vmem>>, %arg7: memref<4x132xf32, #tpu.memory_space<vmem>>) attributes {dimension_semantics = [#tpu.dimension_semantics<parallel>, #tpu.dimension_semantics<parallel>], iteration_bounds = array<i64: 2, 1>, scalar_prefetch = 0 : i64, scratch_operands = 1 : i64, tpu.core_type = #tpu.core_type<tc>, window_params = [{transform_indices = @transform_0, window_bounds = array<i64: 1, 4, 128>}, {transform_indices = @transform_1, window_bounds = array<i64: 1, 4, 128>}, {pipeline_mode = #tpu.pipeline_mode<synchronous>, transform_indices = @transform_2, window_bounds = array<i64: 3, 8, 4>}, {pipeline_mode = #tpu.pipeline_mode<synchronous>, transform_indices = @transform_3, window_bounds = array<i64: 8, 1>}, {transform_indices = @transform_4, window_bounds = array<i64: 1, 8, 128>}]} {
    %c128_i32 = arith.constant 128 : i32
    %0 = arith.muli %arg1, %c128_i32 : i32
    %c4_i32 = arith.constant 4 : i32
    %1 = arith.subi %0, %c4_i32 : i32
    %c0 = arith.constant 0 : index
    %c0_0 = arith.constant 0 : index
    %c124 = arith.constant 124 : index
    %2 = vector.load %arg3[%c0, %c0_0, %c124] : memref<1x4x128xf32, #tpu.memory_space<vmem>>, vector<1x4x4xf32>
    %3 = vector.shape_cast %2 : vector<1x4x4xf32> to vector<4x4xf32>
    %4 = tpu.iota {dimensions = array<i32: 1>} : vector<4x4xi32>
    %5 = vector.broadcast %1 : i32 to vector<4x4xi32>
    %6 = arith.addi %4, %5 : vector<4x4xi32>
    %c0_i32 = arith.constant 0 : i32
    %7 = vector.broadcast %c0_i32 : i32 to vector<4x4xi32>
    %8 = arith.cmpi sge, %6, %7 : vector<4x4xi32>
    %c16_i32 = arith.constant 16 : i32
    %9 = vector.broadcast %c16_i32 : i32 to vector<4x4xi32>
    %10 = arith.cmpi slt, %6, %9 : vector<4x4xi32>
    %11 = arith.andi %8, %10 : vector<4x4xi1>
    %cst = arith.constant 0.000000e+00 : f32
    %12 = vector.broadcast %cst : f32 to vector<4x4xf32>
    %13 = arith.select %11, %3, %12 : vector<4x4xi1>, vector<4x4xf32>
    %c0_1 = arith.constant 0 : index
    %c0_2 = arith.constant 0 : index
    %14 = vector.load %arg7[%c0_1, %c0_2] : memref<4x132xf32, #tpu.memory_space<vmem>>, vector<4x4xf32>
    tpu.vector_store %arg7[%c0_1, %c0_2], %13 {strides = array<i32>} : memref<4x132xf32, #tpu.memory_space<vmem>>, vector<4x4xf32>,
    %c0_3 = arith.constant 0 : index
    %c0_4 = arith.constant 0 : index
    %c0_5 = arith.constant 0 : index
    %15 = vector.load %arg2[%c0_3, %c0_4, %c0_5] : memref<1x4x128xf32, #tpu.memory_space<vmem>>, vector<1x4x128xf32>
    %16 = vector.shape_cast %15 : vector<1x4x128xf32> to vector<4x128xf32>
    %c0_i32_6 = arith.constant 0 : i32
    %17 = arith.cmpi slt, %arg1, %c0_i32_6 : i32
    %18 = arith.extui %17 : i1 to i32
    %c0_i32_7 = arith.constant 0 : i32
    %19 = arith.cmpi ne, %18, %c0_i32_7 : i32
    scf.if %19 {
      %c0_29 = arith.constant 0 : index
      %c4_30 = arith.constant 4 : index
      %44 = vector.load %arg7[%c0_29, %c4_30] : memref<4x132xf32, #tpu.memory_space<vmem>>, vector<4x128xf32>
      tpu.vector_store %arg7[%c0_29, %c4_30], %16 {strides = array<i32>} : memref<4x132xf32, #tpu.memory_space<vmem>>, vector<4x128xf32>,
    } else {
    }
    %true = arith.constant true
    %20 = arith.xori %17, %true : i1
    %21 = arith.extui %20 : i1 to i32
    %c0_i32_8 = arith.constant 0 : i32
    %22 = arith.cmpi ne, %21, %c0_i32_8 : i32
    scf.if %22 {
      %44 = tpu.iota {dimensions = array<i32: 1>} : vector<4x128xi32>
      %c128_i32_29 = arith.constant 128 : i32
      %45 = arith.muli %arg1, %c128_i32_29 : i32
      %c16_i32_30 = arith.constant 16 : i32
      %46 = arith.subi %c16_i32_30, %45 : i32
      %47 = vector.broadcast %46 : i32 to vector<4x128xi32>
      %48 = arith.cmpi slt, %44, %47 : vector<4x128xi32>
      %cst_31 = arith.constant 0.000000e+00 : f32
      %49 = vector.broadcast %cst_31 : f32 to vector<4x128xf32>
      %50 = arith.select %48, %16, %49 : vector<4x128xi1>, vector<4x128xf32>
      %c0_32 = arith.constant 0 : index
      %c4_33 = arith.constant 4 : index
      %51 = vector.load %arg7[%c0_32, %c4_33] : memref<4x132xf32, #tpu.memory_space<vmem>>, vector<4x128xf32>
      tpu.vector_store %arg7[%c0_32, %c4_33], %50 {strides = array<i32>} : memref<4x132xf32, #tpu.memory_space<vmem>>, vector<4x128xf32>,
    } else {
    }
    %c0_9 = arith.constant 0 : index
    %c0_10 = arith.constant 0 : index
    %23 = vector.load %arg5[%c0_9, %c0_10] : memref<8x1xf32, #tpu.memory_space<vmem>>, vector<8x1xf32>
    %24 = vector.shape_cast %23 : vector<8x1xf32> to vector<8x1xf32>
    %25 = vector.broadcast %24 : vector<8x1xf32> to vector<8x128xf32>
    %c0_11 = arith.constant 0 : index
    %c0_12 = arith.constant 0 : index
    %26 = vector.load %arg7[%c0_11, %c0_12] : memref<4x132xf32, #tpu.memory_space<vmem>>, vector<4x128xf32>
    %c0_13 = arith.constant 0 : index
    %c0_14 = arith.constant 0 : index
    %c0_15 = arith.constant 0 : index
    %27 = vector.load %arg4[%c0_13, %c0_14, %c0_15] : memref<3x8x4xf32, #tpu.memory_space<vmem>>, vector<1x8x4xf32>
    %28 = vector.shape_cast %27 : vector<1x8x4xf32> to vector<8x4xf32>
    %cst_16 = arith.constant dense<0.000000e+00> : vector<8x128xf32>
    %29 = tpu.matmul %28, %26, %cst_16 {dimension_numbers = #tpu.dot_dimension_numbers<[1], [0], [0], [1], [0, 0, 1, 1], [], []>} : vector<8x4xf32>, vector<4x128xf32>, vector<8x128xf32> -> vector<8x128xf32>
    %30 = arith.addf %25, %29 : vector<8x128xf32>
    %c0_17 = arith.constant 0 : index
    %c2 = arith.constant 2 : index
    %31 = vector.load %arg7[%c0_17, %c2] : memref<4x132xf32, #tpu.memory_space<vmem>>, vector<4x128xf32>
    %c1 = arith.constant 1 : index
    %c0_18 = arith.constant 0 : index
    %c0_19 = arith.constant 0 : index
    %32 = vector.load %arg4[%c1, %c0_18, %c0_19] : memref<3x8x4xf32, #tpu.memory_space<vmem>>, vector<1x8x4xf32>
    %33 = vector.shape_cast %32 : vector<1x8x4xf32> to vector<8x4xf32>
    %cst_20 = arith.constant dense<0.000000e+00> : vector<8x128xf32>
    %34 = tpu.matmul %33, %31, %cst_20 {dimension_numbers = #tpu.dot_dimension_numbers<[1], [0], [0], [1], [0, 0, 1, 1], [], []>} : vector<8x4xf32>, vector<4x128xf32>, vector<8x128xf32> -> vector<8x128xf32>
    %35 = arith.addf %30, %34 : vector<8x128xf32>
    %c0_21 = arith.constant 0 : index
    %c4 = arith.constant 4 : index
    %36 = vector.load %arg7[%c0_21, %c4] : memref<4x132xf32, #tpu.memory_space<vmem>>, vector<4x128xf32>
    %c2_22 = arith.constant 2 : index
    %c0_23 = arith.constant 0 : index
    %c0_24 = arith.constant 0 : index
    %37 = vector.load %arg4[%c2_22, %c0_23, %c0_24] : memref<3x8x4xf32, #tpu.memory_space<vmem>>, vector<1x8x4xf32>
    %38 = vector.shape_cast %37 : vector<1x8x4xf32> to vector<8x4xf32>
    %cst_25 = arith.constant dense<0.000000e+00> : vector<8x128xf32>
    %39 = tpu.matmul %38, %36, %cst_25 {dimension_numbers = #tpu.dot_dimension_numbers<[1], [0], [0], [1], [0, 0, 1, 1], [], []>} : vector<8x4xf32>, vector<4x128xf32>, vector<8x128xf32> -> vector<8x128xf32>
    %40 = arith.addf %35, %39 : vector<8x128xf32>
    %c0_26 = arith.constant 0 : index
    %c0_27 = arith.constant 0 : index
    %c0_28 = arith.constant 0 : index
    %41 = vector.load %arg6[%c0_26, %c0_27, %c0_28] : memref<1x8x128xf32, #tpu.memory_space<vmem>>, vector<1x8x128xf32>
    %42 = vector.shape_cast %41 : vector<1x8x128xf32> to vector<8x128xf32>
    %43 = vector.shape_cast %40 : vector<8x128xf32> to vector<1x8x128xf32>
    tpu.vector_store %arg6[%c0_26, %c0_27, %c0_28], %43 {strides = array<i32>} : memref<1x8x128xf32, #tpu.memory_space<vmem>>, vector<1x8x128xf32>,
    return
  }
  func.func @transform_0(%arg0: i32, %arg1: i32) -> (i32, i32, i32) {
    %c0_i32 = arith.constant 0 : i32
    %0 = arith.minsi %arg1, %c0_i32 : i32
    %c0_i32_0 = arith.constant 0 : i32
    %c0_i32_1 = arith.constant 0 : i32
    return %arg0, %c0_i32_0, %0 : i32, i32, i32
  }
  func.func @transform_1(%arg0: i32, %arg1: i32) -> (i32, i32, i32) {
    %c1_i32 = arith.constant 1 : i32
    %0 = arith.muli %arg1, %c1_i32 : i32
    %c1_i32_0 = arith.constant 1 : i32
    %1 = arith.subi %0, %c1_i32_0 : i32
    %c0_i32 = arith.constant 0 : i32
    %c0_i32_1 = arith.constant 0 : i32
    %2 = arith.maxsi %c0_i32, %1 : i32
    %3 = arith.minsi %c0_i32_1, %2 : i32
    %c0_i32_2 = arith.constant 0 : i32
    %c0_i32_3 = arith.constant 0 : i32
    return %arg0, %c0_i32_2, %3 : i32, i32, i32
  }
  func.func @transform_2(%arg0: i32, %arg1: i32) -> (i32, i32, i32) {
    %c0_i32 = arith.constant 0 : i32
    %c0_i32_0 = arith.constant 0 : i32
    %c0_i32_1 = arith.constant 0 : i32
    %c0_i32_2 = arith.constant 0 : i32
    return %c0_i32, %c0_i32_0, %c0_i32_1 : i32, i32, i32
  }
  func.func @transform_3(%arg0: i32, %arg1: i32) -> (i32, i32) {
    %c0_i32 = arith.constant 0 : i32
    %c0_i32_0 = arith.constant 0 : i32
    %c0_i32_1 = arith.constant 0 : i32
    return %c0_i32, %c0_i32_0 : i32, i32
  }
  func.func @transform_4(%arg0: i32, %arg1: i32) -> (i32, i32, i32) {
    %c0_i32 = arith.constant 0 : i32
    %c0_i32_0 = arith.constant 0 : i32
    return %arg0, %c0_i32, %arg1 : i32, i32, i32
  }
}

</mosaic_0001>

<bundles_post_ra>
// kernel: tpu_custom_call.1
= control target key start
LH: loop header
LB: loop body
LE: loop exit
PB: predicated region body
PF: predicated region fallthrough
CT: control target
= control target key end

     0   :  { %9 = vsyncpa [#allocation4], 0  ;;  %s1054_s0 = inlined_call_operand.vmem [shape: f32[2,4,16], index: 0, kind: input, shape index: {}]   ;;  %s1055_s1 = inlined_call_operand.vmem [shape: f32[2,4,16], index: 1, kind: input, shape index: {}]   ;;  %s1056_s2 = inlined_call_operand.vmem [shape: f32[3,8,4], index: 2, kind: input, shape index: {}]   ;;  %s1057_s3 = inlined_call_operand.vmem [shape: f32[8,1], index: 3, kind: input, shape index: {}]   ;;  %s1058_s4 = inlined_call_operand.hbm [shape: f32[2,8,20], index: 4, kind: output, shape index: {}]  }
   0x1   :  { %11 = vsyncpa [#allocation4 + $0x1], 0  ;;  %s924_s15 = smov 0   ;;  %s926_s16 = smov 0  }
   0x2   :  { %s928_s17 = smov 0   ;;  %s930_s18 = smov 0  }
   0x3   :  { %s932_s19 = smov 0   ;;  %s934_s20 = smov 0  }
   0x4 LB: > { %s710_s21 = sadd.s32 4294967295, %s890_s20   ;;  %s711_s22 = sadd.s32 4294967294, %s890_s20   ;;  %s890_s20 = sphi %s934_s20, %s17_s20   ;;  %s886_s19 = sphi %s932_s19, %s1065_s19   ;;  %s882_s18 = sphi %s930_s18, %s1064_s18   ;;  %s878_s17 = sphi %s928_s17, %s1063_s17   ;;  %s874_s16 = sphi %s926_s16, %s1062_s16   ;;  %s870_s15 = sphi %s924_s15, %s1061_s15  }
   0x5   : > { %s29_s23 = sadd.s32 1, %s886_s19  ;;  %s150_s24 = sadd.s32 1, %s878_s17 }
   0x6   : > { %p31_p0 = scmp.ge.s32.totalorder %s29_s23, 2  ;;  %p160_p1 = scmp.ne.s32.totalorder %s878_s17, %s874_s16 }
   0x7   : > { %p161_p2 = scmp.eq.s32.totalorder %s710_s21, 1  ;;  %p166_p3 = scmp.ne.s32.totalorder %s874_s16, %s870_s15 }
   0x8   : > { %s1067_s23 = smov (%p31_p0, %s29_s23), 0  ;;  %p167_p5 = scmp.eq.s32.totalorder %s711_s22, 1 }
   0x9   : > { %p964_p4 = por %p161_p2, %p160_p1  ;;  %s145_s26 = ssub.s32 %s886_s19, %s1067_s23 }
   0xa   : > { %p714_p6 = scmp.ge.s32.totalorder %s890_s20, 1  ;;  %p148_p7 = scmp.eq.s32.totalorder %s145_s26, 0 }
   0xb   : > { %p971_p8 = por %p167_p5, %p166_p3  ;;  %p225_p9 = scmp.lt.s32.totalorder %s890_s20, 3 }
   0xc   : > { %s977_s28 = scalar_select %p148_p7, %s878_s17, %s150_s24  }
   0xd   : > { %p226_p10 = pnand %p714_p6, %p225_p9 }
   0xe   : > { %p269_p11 = scmp.lt.s32.totalorder (!%p226_p10), %s882_s18, 1  ;;  %s893_s11 = smov (!%p226_p10), 4  }
   0xf   : > { %229 = sbr.rel (%p226_p10) target bundleno = 488 (0x1e8), region = 36  ;;  %s896_s14 = smov (!%p226_p10), 124  }
  0x10   : > { %s897_s21 = smov (!%p226_p10), 126   ;;  %s264_s6 = sand.u32 (!%p226_p10), 1, %s874_s16  }
  0x11   : > { %s727_s8 = sshll.u32 (!%p226_p10), %s882_s18, 7  ;;  %s898_s22 = smov (!%p226_p10), [#allocation3]  }
  0x12   : > { %s1014_s13 = scalar_lea.hbm (!%p226_p10), %s1058_s4, %s727_s8 }
  0x14   : > { %v298_v0 = vlaneseq  ;;  %s270_s29 = scalar_select %p269_p11, %s882_s18, 1  ;;  %v892_v2 = vmov 0.0   ;;  %vm343_vm3 = vcmask 1043488   ;;  %vm344_vm4 = vcmask 31748   ;;  %v354_v15 = vld [vmem:[%s1056_s2] sm:$0xff]  ;;  %v720_v20 = vld [vmem:[%s1056_s2 + $0x8] sm:$0xff] }
  0x15   : > { %736 = vmatprep.subr.mxu0 %v892_v2  ;;  %741 = vmatprep.subr.mxu1 %v892_v2  ;;  %vm340_vm6 = vcmask 31744   ;;  %vm310_vm7 = vcmask 27648   ;;  %vm345_vm8 = vmor %vm344_vm4, %vm343_vm3  ;;  %vm894_vm9 = vmmov 0   ;;  %vm359_vm10 = vcmask 1043456   ;;  %v347_v16 = vld [vmem:[%s1057_s3] sm:$0xff]  ;;  %v723_v24 = vld [vmem:[%s1056_s2 + $0x10] sm:$0xff] }
  0x16   : > { %v299_v1 = vand.u32 127, %v298_v0  ;;  %s716_s30 = sshll.u32 %s270_s29, 2  ;;  %738 = vmatprep.mubr.msk.f32.mxu0 %vm894_vm9, %v892_v2  ;;  %743 = vmatprep.mubr.msk.f32.mxu1 %vm894_vm9, %v892_v2  ;;  %v895_v12 = vmov 0   ;;  %vm443_vm11 = vcmask 1031168   ;;  %vm530_vm12 = vcmask 1014784   ;;  %s818_s18 = sshll.u32 %s898_s22, 4  ;;  %s819_s18 = int_to_ptr.vmem [resolvable:$false] %s818_s18 }
  0x17   : > { %s275_s7 = scalar_lea.vmem %s1054_s0, %s716_s30  ;;  %s289_s10 = scalar_lea.vmem %s1055_s1, %s716_s30  ;;  %812 = vset.pattern.permute.xlu0 %v895_v12 }
  0x18   : > { %vm334_vm0 = vcmp.lt.s32.totalorder %v299_v1, 16  ;;  %v312_v3 = vld [vmem:[%s275_s7] sm:$0xf]  ;;  %v301_v6 = vadd.s32 4294967292, %v299_v1  ;;  %s715_s7 = sshll.u32 %s264_s6, 3  ;;  %s820_s24 = scalar_lea.vmem %s819_s18, 256 }
  0x19   : > { %v335_v4 = vsel %vm334_vm0, %v312_v3, 0.0  ;;  %v297_v5 = vld [vmem:[%s289_s10] sm:$0xf]  ;;  %s266_s9 = scalar_lea.vmem [#allocation3], %s715_s7 }
  0x1a   : > { %337 = vrot.lane.b32.xlu0 %v335_v4, %s893_s11  ;;  %vm302_vm1 = vcmp.ge.s32.totalorder %v301_v6, 0  ;;  %vm303_vm2 = vcmp.lt.s32.totalorder %v301_v6, 16  ;;  %s624_s10 = sshll.u32 %s266_s9, 4  ;;  %s625_s10 = int_to_ptr.vmem [resolvable:$true] %s624_s10 }
  0x1b   : > { %vm304_vm5 = vmand %vm302_vm1, %vm303_vm2  ;;  %p821_p1 = scmp.lt.s32.totalorder %s625_s10, %s819_s18 }
  0x1e   : > { %306 = vrot.lane.b32.xlu0 %v297_v5, %s893_s11 }
  0x8c   : > { %v338_v7 = vpop.permute.xlu0 %337 }
  0x8d   : > { %v339_v8 = vrot.slane %v338_v7, 4 }
  0x8f   : > { %v341_v11 = vsel %vm340_vm6, %v339_v8, %v338_v7 }
  0x90   : > { %v307_v9 = vpop.permute.xlu0 %306 }
  0x91   : > { %v309_v10 = vsel %vm304_vm5, %v307_v9, 0.0 }
  0x92   : > { %311 = vst.msk [vmem:[#allocation2] sm:$0xf] %vm310_vm7, %v309_v10 }
  0x93   : > { %346 = vst.msk [vmem:[#allocation2] sm:$0xff] %vm345_vm8, %v341_v11 }
  0x9a   : > { %v521_v13 = vld [vmem:[#allocation2] sm:$0xff] }
  0x9b   : > { %v353_v14 = vld [vmem:[#allocation2] sm:$0xf]  ;;  %526 = vrot.lane.b32.xlu0 %v521_v13, %s896_s14  ;;  %439 = vrot.lane.b32.xlu1 %v521_v13, %s897_s21  ;;  %v525_v17 = vcombine.high %v521_v13, %v521_v13 }
  0x9c   : > { %737 = vmatpush3.msk.msra.mxu0 %vm359_vm10, %v353_v14 }
  0x9d   : > { %739 = vmatmul.mubr.msk.f32.vlgmr.msra.gmra.mxu0 %vm340_vm6, %v354_v15  ;;  %746 = vmatprep.subr.mxu0 %v892_v2 }
  0x9e   : > { %748 = vmatprep.mubr.msk.f32.mxu0 %vm894_vm9, %v892_v2 }
  0x9f   : > { %441 = vrot.lane.b32.xlu1 %v525_v17, %s897_s21  ;;  %350 = vperm.xlu0 %812, %v347_v16   ;;  %s814_s21 = scalar_lea.vmem %s625_s10, 128 }
  0xa0   : > { %p815_p12 = scmp.ne.s32.totalorder %s625_s10, %s814_s21  ;;  %p822_p2 = scmp.lt.s32.totalorder %s820_s24, %s814_s21 }
  0xa2   : > { %p816_p13 = pnand %p815_p12, %p964_p4  ;;  %p823_p3 = por %p822_p2, %p821_p1 }
  0xa3   : > { %528 = vrot.lane.b32.xlu1 %v525_v17, %s896_s14  ;;  %s610_s14 = scalar_lea.sflag [#allocation4], %s264_s6 }
  0xa4   : > { %p817_p0 = pneg %p816_p13 }
  0xa6   : > { %p824_p5 = pnand %p823_p3, %p817_p0 }
 0x10d   : > { %v440_v18 = vpop.permute.xlu1 %439  ;;  %v527_v22 = vpop.permute.xlu0 %526 }
 0x111   : > { %v442_v19 = vpop.permute.xlu1 %441 }
 0x112   : > { %v444_v21 = vsel %vm443_vm11, %v440_v18, %v442_v19 }
 0x113   : > { %742 = vmatpush3.msk.msra.mxu1 %vm359_vm10, %v444_v21 }
 0x114   : > { %744 = vmatmul.mubr.msk.f32.vlgmr.msra.gmra.mxu1 %vm340_vm6, %v720_v20 }
 0x115   : > { %v529_v23 = vpop.permute.xlu1 %528 }
 0x116   : > { %v531_v25 = vsel %vm530_vm12, %v527_v22, %v529_v23 }
 0x117   : > { %747 = vmatpush3.msk.msra.mxu0 %vm359_vm10, %v531_v25 }
 0x118   : > { %749 = vmatmul.mubr.msk.f32.vlgmr.msra.gmra.mxu0 %vm340_vm6, %v723_v24 }
 0x11a   : > { %v351_v28 = vpop.permute.xlu0 %350 }
 0x15d   : > { %v429_v26 = vpop.f32.mrf.mxu0 }
 0x15e   : > { %v433_v29 = vadd.f32 %v429_v26, %v351_v28 }
 0x15f   : > { %v740_v27 = vpop.f32.mrf.mxu0 }
 0x1d4   : > { %v516_v30 = vpop.f32.mrf.mxu1 }
 0x1d5   : > { %v520_v31 = vadd.f32 %v516_v30, %v433_v29 }
 0x1d6   : > { %v745_v32 = vpop.f32.mrf.mxu1 }
 0x1d8   : > { %v603_v33 = vpop.f32.mrf.mxu0 }
 0x1d9   : > { %v607_v34 = vadd.f32 %v603_v33, %v520_v31 }
 0x1da   : > { %v750_v35 = vpop.f32.mrf.mxu0 }
 0x1db   : > { %608 = vst [vmem:[%s266_s9] sm:$0xff] %v607_v34 }
 0x1dc   : > { %827 = shalt.err (!%p824_p5)
}
 0x1dd   : > { %s828_s26 = scalar_lea.hbm %s1014_s13, 128  ;;  %s832_s5 = scalar_lea.hbm %s1058_s4, 256 }
 0x1de   : > { %p829_p6 = scmp.ne.s32.totalorder %s1014_s13, %s828_s26  ;;  %p833_p10 = scmp.lt.s32.totalorder %s1014_s13, %s1058_s4 }
 0x1df   : > { %p834_p11 = scmp.lt.s32.totalorder %s832_s5, %s828_s26 }
 0x1e0   : > { %p830_p7 = pnand %p829_p6, %p964_p4 }
 0x1e1   : > { %p835_p12 = por %p834_p11, %p833_p10 }
 0x1e2   : > { %p831_p9 = pneg %p830_p7 }
 0x1e4   : > { %p836_p13 = pnand %p835_p12, %p831_p9 }
 0x1e6   : > { %839 = shalt.err (!%p836_p13)
}
 0x1e7   : > { %751 = dma.vmem_to_hbm [thread:$0]  (%p964_p4), %s625_s10, 128, %s1014_s13, %s610_s14  }
 0x1e8 PF: > { %p757_p0 = scmp.ge.s32.totalorder %s890_s20, 2  ;;  %s636_s8 = sand.u32 1, %s870_s15  }
 0x1e9   : > { %s637_s9 = scalar_lea.sflag [#allocation4], %s636_s8 }
 0x1ea   : > { %p754_p1 = pnand %p757_p0, %p971_p8 }
 0x1ec   : > { %p755_p2 = pneg %p754_p1 }
 0x1ee   : > { %865 = dma.done.wait (%p755_p2), %s637_s9, 128  }
 0x1ef   : > { %867 = vsyncadd (%p755_p2), %s637_s9, 4294967168  ;;  %s17_s20 = sadd.s32 1, %s890_s20   ;;  %s1061_s15 = smov %s874_s16 }
 0x1f0   : > { %p14_p3 = scmp.ge.s32.totalorder %s17_s20, 4   ;;  %s1062_s16 = smov %s878_s17 }
 0x1f1   : > { %s1063_s17 = smov %s977_s28  ;;  %s1064_s18 = smov %s886_s19 }
 0x1f2   : > { %s1065_s19 = smov %s1067_s23  ;;  %16 = sbr.rel (!%p14_p3) target bundleno = 4 (0x4), region = 84 }
 0x1f7   :  { %642 = vsyncpa [#allocation4], 1 }
 0x1f8   :  { %644 = vsyncpa [#allocation4 + $0x1], 1 }

</bundles_post_ra>
